<compile_context>
chip_gen: v7x
topology: tpu7x:2x2x1
jax: 0.10.0
libtpu: 0.0.40
codegen_flags: <defaults>
</compile_context>

<pallas_src>
import functools

import numpy as np
import jax
import jax.numpy as jnp
from jax.experimental import pallas as pl
from jax.experimental.pallas import tpu as pltpu

_MIB = 1024 * 1024


def _round_up(x, m):
    return ((x + m - 1) // m) * m


def _masked_softmax_ce_mean(sim, n_true):
    """mean_i CE(sim[i, :], target=i) over the first n_true rows/cols of sim (f32)."""
    row = jax.lax.broadcasted_iota(jnp.int32, sim.shape, 0)
    col = jax.lax.broadcasted_iota(jnp.int32, sim.shape, 1)
    # Mask padded columns out of the log-sum-exp.
    sim_m = jnp.where(col < n_true, sim, jnp.float32(-1e30))
    m = jnp.max(sim_m, axis=-1, keepdims=True)
    lse = m + jnp.log(jnp.sum(jnp.exp(sim_m - m), axis=-1, keepdims=True))
    diag = jnp.sum(jnp.where(row == col, sim, 0.0), axis=-1, keepdims=True)
    losses = lse - diag                                          # (n_pad, 1)
    row_valid = jax.lax.broadcasted_iota(jnp.int32, losses.shape, 0) < n_true
    total = jnp.sum(jnp.where(row_valid, losses, 0.0))
    return total / jnp.float32(n_true)


def _npair_single_kernel(a_ref, pt_ref, loss_ref, *, n_true):
    """Single invocation: full (N, D) x (D, N) contraction + fused CE epilogue."""
    sim = jnp.dot(a_ref[...], pt_ref[...], preferred_element_type=jnp.float32)
    loss_ref[0] = _masked_softmax_ce_mean(sim, n_true)


def _npair_tiled_kernel(a_ref, pt_ref, loss_ref, sim_acc, *, n_true):
    """K-tiled fallback: grid axis 0 tiles D; sim accumulated in VMEM scratch."""
    k = pl.program_id(0)

    @pl.when(k == 0)
    def _():
        sim_acc[...] = jnp.zeros_like(sim_acc)

    sim_acc[...] += jnp.dot(a_ref[...], pt_ref[...],
                            preferred_element_type=jnp.float32)

    @pl.when(k == pl.num_programs(0) - 1)
    def _():
        loss_ref[0] = _masked_softmax_ce_mean(sim_acc[...], n_true)


def _npair_loss_pallas(anchors, positives, *, tk=None, force_tiled=False):
    n, d = anchors.shape
    itemsize = anchors.dtype.itemsize
    n_pad = max(8, _round_up(n, 8))

    # Pad N (rows) with zeros; padded rows/cols are masked inside the kernel.
    if n_pad != n:
        anchors = jnp.pad(anchors, ((0, n_pad - n), (0, 0)))
        positives = jnp.pad(positives, ((0, n_pad - n), (0, 0)))

    # ---- Fast path: everything fits comfortably in VMEM -> single invocation. ----
    single_bytes = 2 * n_pad * d * itemsize + 6 * n_pad * n_pad * 4
    if not force_tiled and single_bytes <= 16 * _MIB:
        out = pl.pallas_call(
            functools.partial(_npair_single_kernel, n_true=n),
            out_shape=jax.ShapeDtypeStruct((1,), jnp.float32),
            in_specs=[
                pl.BlockSpec(memory_space=pltpu.MemorySpace.VMEM),
                pl.BlockSpec(memory_space=pltpu.MemorySpace.VMEM),
            ],
            out_specs=pl.BlockSpec(memory_space=pltpu.MemorySpace.SMEM),
            compiler_params=pltpu.CompilerParams(vmem_limit_bytes=32 * _MIB),
        )(anchors, positives.T)
        return out[0]

    # ---- K-tiled fallback for very large feature dims. ----
    # TODO(synk): for N >= ~2048 the (N, N) f32 accumulator needs a row-tiled /
    # online-softmax variant (notably on v7x's 64 MiB VMEM).
    d128 = _round_up(d, 128)
    if tk is None:
        budget = 20 * _MIB - 6 * n_pad * n_pad * 4     # room for acc + epilogue temps
        tk = budget // (4 * n_pad * itemsize)          # 2 inputs x 2 pipeline buffers
        tk = max(128, min(2048, (tk // 128) * 128))
    tk = min(tk, d128)
    d_pad = _round_up(d128, tk)
    if d_pad != d:
        anchors = jnp.pad(anchors, ((0, 0), (0, d_pad - d)))
        positives = jnp.pad(positives, ((0, 0), (0, d_pad - d)))
    positives_t = positives.T                          # (d_pad, n_pad) canonical RHS

    out = pl.pallas_call(
        functools.partial(_npair_tiled_kernel, n_true=n),
        out_shape=jax.ShapeDtypeStruct((1,), jnp.float32),
        grid_spec=pltpu.PrefetchScalarGridSpec(
            num_scalar_prefetch=0,
            grid=(d_pad // tk,),
            in_specs=[
                pl.BlockSpec((n_pad, tk), lambda k: (0, k)),
                pl.BlockSpec((tk, n_pad), lambda k: (k, 0)),
            ],
            out_specs=pl.BlockSpec(memory_space=pltpu.MemorySpace.SMEM),
            scratch_shapes=[pltpu.VMEM((n_pad, n_pad), jnp.float32)],
        ),
        compiler_params=pltpu.CompilerParams(
            dimension_semantics=("arbitrary",),
            vmem_limit_bytes=32 * _MIB,
        ),
    )(anchors, positives_t)
    return out[0]


def _get_npair_indices(labels_np):
    """Mirror lmu.convert_to_pos_pairs_with_unique_labels on host (numpy)."""
    n = len(labels_np)
    a_list, p_list = [], []
    for i in range(n):              # row-major all-positive-pairs order
        for j in range(n):
            if i != j and labels_np[i] == labels_np[j]:
                a_list.append(i)
                p_list.append(j)
    if not a_list:
        return np.zeros((0,), np.int32), np.zeros((0,), np.int32)
    a_arr = np.asarray(a_list, np.int32)
    p_arr = np.asarray(p_list, np.int32)
    _, unique_idx = np.unique(labels_np[a_arr], return_index=True)
    return a_arr[unique_idx], p_arr[unique_idx]


def npair_loss(embeddings, labels_np, l2_reg=0, *, tk=None, force_tiled=False):
    """Forward pass of NPairLoss.  `labels_np` is a host numpy int array (B,)."""
    del l2_reg  # stored by the torch module but unused in forward()
    anchor_idx, positive_idx = _get_npair_indices(np.asarray(labels_np))
    if anchor_idx.shape[0] == 0:
        return jnp.float32(0.0)
    # TODO(synk): for D >= ~1024 the row gather could be fused into the kernel via
    # scalar-prefetched indices + manual DMA to save one HBM round trip.
    anchors = jnp.take(embeddings, jnp.asarray(anchor_idx), axis=0)
    positives = jnp.take(embeddings, jnp.asarray(positive_idx), axis=0)
    return _npair_loss_pallas(anchors, positives, tk=tk, force_tiled=force_tiled)


def _npair_loss_ref(embeddings, labels_np):
    """Pure-JAX reference for correctness checking."""
    anchor_idx, positive_idx = _get_npair_indices(np.asarray(labels_np))
    a = embeddings[np.asarray(anchor_idx)]
    p = embeddings[np.asarray(positive_idx)]
    sim = a @ p.T
    logprobs = jax.nn.log_softmax(sim, axis=-1)
    n = sim.shape[0]
    return -jnp.mean(logprobs[jnp.arange(n), jnp.arange(n)])


if __name__ == "__main__":
    rng = np.random.RandomState(0)
    key = jax.random.PRNGKey(0)
    k1, k2 = jax.random.split(key)

    def make_labels(batch):
        # batch//2 labels, each appearing exactly twice -> batch//2 pairs
        return rng.permutation(np.repeat(np.arange(batch // 2, dtype=np.int32), 2))

    # Test 1: single-invocation fast path (B=16, D=256 -> N=8 pairs).
    emb1 = jax.random.normal(k1, (16, 256), dtype=jnp.float32)
    labels1 = make_labels(16)
    loss1 = jax.block_until_ready(npair_loss(emb1, labels1))
    ref1 = _npair_loss_ref(emb1, labels1)
    np.testing.assert_allclose(np.asarray(loss1), np.asarray(ref1),
                               rtol=1e-4, atol=1e-4)

    # Test 2: K-tiled fallback path (forced), D=1024, tk=256 -> 4 grid steps.
    emb2 = jax.random.normal(k2, (16, 1024), dtype=jnp.float32)
    labels2 = make_labels(16)
    loss2 = jax.block_until_ready(npair_loss(emb2, labels2,
                                             force_tiled=True, tk=256))
    ref2 = _npair_loss_ref(emb2, labels2)
    np.testing.assert_allclose(np.asarray(loss2), np.asarray(ref2),
                               rtol=1e-4, atol=1e-4)

    print("KERNEL_OK")
</pallas_src>

<mosaic_0001>
module attributes {stable_mosaic.version = 11 : i64} {
  func.func @_npair_single_kernel(%arg0: memref<8x256xf32, #tpu.memory_space<vmem>>, %arg1: memref<256x8xf32, #tpu.memory_space<vmem>>, %arg2: memref<1xf32, #tpu.memory_space<smem>>) attributes {dimension_semantics = [], scalar_prefetch = 0 : i64, scratch_operands = 0 : i64, tpu.core_type = #tpu.core_type<tc>} {
    %c0 = arith.constant 0 : index
    %c0_0 = arith.constant 0 : index
    %0 = vector.load %arg0[%c0, %c0_0] : memref<8x256xf32, #tpu.memory_space<vmem>>, vector<8x256xf32>
    %c0_1 = arith.constant 0 : index
    %c0_2 = arith.constant 0 : index
    %1 = vector.load %arg1[%c0_1, %c0_2] : memref<256x8xf32, #tpu.memory_space<vmem>>, vector<256x8xf32>
    %cst = arith.constant dense<0.000000e+00> : vector<8x8xf32>
    %2 = tpu.matmul %0, %1, %cst {dimension_numbers = #tpu.dot_dimension_numbers<[1], [0], [0], [1], [0, 0, 1, 1], [], []>} : vector<8x256xf32>, vector<256x8xf32>, vector<8x8xf32> -> vector<8x8xf32>
    %3 = tpu.iota {dimensions = array<i32: 0>} : vector<8x8xi32>
    %4 = tpu.iota {dimensions = array<i32: 1>} : vector<8x8xi32>
    %c8_i32 = arith.constant 8 : i32
    %5 = vector.broadcast %c8_i32 : i32 to vector<8x8xi32>
    %6 = arith.cmpi slt, %4, %5 : vector<8x8xi32>
    %cst_3 = arith.constant -1.000000e+30 : f32
    %7 = vector.broadcast %cst_3 : f32 to vector<8x8xf32>
    %8 = arith.select %6, %2, %7 : vector<8x8xi1>, vector<8x8xf32>
    %cst_4 = arith.constant dense<0xFF800000> : vector<8xf32>
    %9 = vector.multi_reduction <maximumf>, %8, %cst_4 [1] : vector<8x8xf32> to vector<8xf32>
    %10 = vector.shape_cast %9 : vector<8xf32> to vector<8x1xf32>
    %11 = vector.broadcast %10 : vector<8x1xf32> to vector<8x8xf32>
    %12 = arith.subf %8, %11 : vector<8x8xf32>
    %13 = math.exp %12 : vector<8x8xf32>
    %cst_5 = arith.constant dense<0.000000e+00> : vector<8xf32>
    %14 = vector.multi_reduction <add>, %13, %cst_5 [1] : vector<8x8xf32> to vector<8xf32>
    %15 = vector.shape_cast %14 : vector<8xf32> to vector<8x1xf32>
    %16 = math.log %15 : vector<8x1xf32>
    %17 = arith.addf %10, %16 : vector<8x1xf32>
    %18 = arith.cmpi eq, %3, %4 : vector<8x8xi32>
    %cst_6 = arith.constant 0.000000e+00 : f32
    %19 = vector.broadcast %cst_6 : f32 to vector<8x8xf32>
    %20 = arith.select %18, %2, %19 : vector<8x8xi1>, vector<8x8xf32>
    %cst_7 = arith.constant dense<0.000000e+00> : vector<8xf32>
    %21 = vector.multi_reduction <add>, %20, %cst_7 [1] : vector<8x8xf32> to vector<8xf32>
    %22 = vector.shape_cast %21 : vector<8xf32> to vector<8x1xf32>
    %23 = arith.subf %17, %22 : vector<8x1xf32>
    %24 = tpu.iota {dimensions = array<i32: 0>} : vector<8x1xi32>
    %c8_i32_8 = arith.constant 8 : i32
    %25 = vector.broadcast %c8_i32_8 : i32 to vector<8x1xi32>
    %26 = arith.cmpi slt, %24, %25 : vector<8x1xi32>
    %cst_9 = arith.constant 0.000000e+00 : f32
    %27 = vector.broadcast %cst_9 : f32 to vector<8x1xf32>
    %28 = arith.select %26, %23, %27 : vector<8x1xi1>, vector<8x1xf32>
    %29 = vector.shape_cast %28 : vector<8x1xf32> to vector<1x8x1xf32>
    %cst_10 = arith.constant dense<0.000000e+00> : vector<1xf32>
    %30 = vector.multi_reduction <add>, %29, %cst_10 [1, 2] : vector<1x8x1xf32> to vector<1xf32>
    %31 = vector.shape_cast %30 : vector<1xf32> to vector<1x1x1xf32>
    %32 = vector.extract %31[0, 0, 0] : f32 from vector<1x1x1xf32>
    %cst_11 = arith.constant 8.000000e+00 : f32
    %33 = arith.divf %32, %cst_11 : f32
    %c0_12 = arith.constant 0 : index
    %34 = memref.load %arg2[%c0_12] : memref<1xf32, #tpu.memory_space<smem>>
    memref.store %33, %arg2[%c0_12] : memref<1xf32, #tpu.memory_space<smem>>
    return
  }
}

</mosaic_0001>

<bundles_post_ra>
// kernel: tpu_custom_call.1
= control target key start
LH: loop header
LB: loop body
LE: loop exit
PB: predicated region body
PF: predicated region fallthrough
CT: control target
= control target key end

     0   :  { %s388_s0 = inlined_call_operand.vmem [shape: f32[8,256], index: 0, kind: input, shape index: {}]   ;;  %s389_s1 = inlined_call_operand.vmem [shape: f32[256,8], index: 1, kind: input, shape index: {}]   ;;  %s390_s2 = inlined_call_operand.hbm [shape: f32[1], index: 2, kind: output, shape index: {}]  }
   0x1   :  { %v30_v0 = vld [vmem:[%s389_s1 + $0x80] sm:$0xff]  ;;  %v31_v1 = vld [vmem:[%s389_s1 + $0x88] sm:$0xff]  ;;  %v32_v5 = vld [vmem:[%s389_s1 + $0x90] sm:$0xff] }
   0x2   :  { %v14_v2 = vld [vmem:[%s389_s1] sm:$0xff]  ;;  %v207_v3 = vpack.c.bf16 %v31_v1, %v30_v0  ;;  %v15_v4 = vld [vmem:[%s389_s1 + $0x8] sm:$0xff]  ;;  %v33_v6 = vld [vmem:[%s389_s1 + $0x98] sm:$0xff] }
   0x3   :  { %v209_v7 = vpack.c.bf16 %v15_v4, %v14_v2  ;;  %v211_v8 = vpack.c.bf16 %v33_v6, %v32_v5  ;;  %v16_v9 = vld [vmem:[%s389_s1 + $0x10] sm:$0xff]  ;;  %v17_v10 = vld [vmem:[%s389_s1 + $0x18] sm:$0xff]  ;;  %v34_v11 = vld [vmem:[%s389_s1 + $0xa0] sm:$0xff] }
   0x4   :  { %208 = vmatprep.subr.bf16.mxu0 %v207_v3  ;;  %v35_v12 = vld [vmem:[%s389_s1 + $0xa8] sm:$0xff]  ;;  %v213_v13 = vpack.c.bf16 %v17_v10, %v16_v9  ;;  %v18_v15 = vld [vmem:[%s389_s1 + $0x20] sm:$0xff]  ;;  %v36_v17 = vld [vmem:[%s389_s1 + $0xb0] sm:$0xff] }
   0x5   :  { %210 = vmatpush3.bf16.msra.mxu0 %v209_v7  ;;  %v215_v14 = vpack.c.bf16 %v35_v12, %v34_v11  ;;  %v19_v16 = vld [vmem:[%s389_s1 + $0x28] sm:$0xff]  ;;  %v37_v18 = vld [vmem:[%s389_s1 + $0xb8] sm:$0xff]  ;;  %v20_v21 = vld [vmem:[%s389_s1 + $0x30] sm:$0xff] }
   0x6   :  { %212 = vmatprep.subr.bf16.mxu0 %v211_v8  ;;  %v217_v19 = vpack.c.bf16 %v19_v16, %v18_v15  ;;  %v219_v20 = vpack.c.bf16 %v37_v18, %v36_v17  ;;  %v21_v22 = vld [vmem:[%s389_s1 + $0x38] sm:$0xff]  ;;  %v38_v23 = vld [vmem:[%s389_s1 + $0xc0] sm:$0xff]  ;;  %v39_v24 = vld [vmem:[%s389_s1 + $0xc8] sm:$0xff] }
   0x7   :  { %v13_v25 = vld [vmem:[%s388_s0 + $0x8] sm:$0xff] }
   0x8   :  { %110 = vmatprep.mubr.f32.mxu0 %v13_v25 }
   0x9   :  { %214 = vmatpush3.bf16.msra.mxu0 %v213_v13 }
   0xa   :  { %216 = vmatprep.subr.bf16.mxu0 %v215_v14 }
   0xb   :  { %7 = vsyncpa [#allocation3], 0  ;;  %v221_v26 = vpack.c.bf16 %v21_v22, %v20_v21  ;;  %v223_v27 = vpack.c.bf16 %v39_v24, %v38_v23  ;;  %v22_v28 = vld [vmem:[%s389_s1 + $0x40] sm:$0xff]  ;;  %v23_v29 = vld [vmem:[%s389_s1 + $0x48] sm:$0xff]  ;;  %v116_v50 = vlaneseq  ;;  %vm122_vm2 = vcmask 64512   ;;  %s246_s23 = scalar_lea.hbm %s390_s2, 16 }
   0xc   :  { %v40_v30 = vld [vmem:[%s389_s1 + $0xd0] sm:$0xff]  ;;  %v41_v31 = vld [vmem:[%s389_s1 + $0xd8] sm:$0xff]  ;;  %v225_v32 = vpack.c.bf16 %v23_v29, %v22_v28  ;;  %v42_v36 = vld [vmem:[%s389_s1 + $0xe0] sm:$0xff]  ;;  %vm143_vm3 = vcmask 7168   ;;  %p247_p0 = scmp.ne.s32.totalorder %s390_s2, %s246_s23  ;;  %p250_p1 = scmp.lt.u32.totalorder %s246_s23, %s390_s2 }
   0xd   :  { %218 = vmatpush3.bf16.msra.mxu0 %v217_v19  ;;  %v227_v33 = vpack.c.bf16 %v41_v31, %v40_v30  ;;  %v24_v34 = vld [vmem:[%s389_s1 + $0x50] sm:$0xff]  ;;  %v25_v35 = vld [vmem:[%s389_s1 + $0x58] sm:$0xff]  ;;  %v43_v37 = vld [vmem:[%s389_s1 + $0xe8] sm:$0xff]  ;;  %v117_v51 = vshrl.u32 %v116_v50, 7  ;;  %v119_v52 = vand.u32 127, %v116_v50 }
   0xe   :  { %220 = vmatprep.subr.bf16.mxu0 %v219_v20  ;;  %v229_v38 = vpack.c.bf16 %v25_v35, %v24_v34  ;;  %v231_v39 = vpack.c.bf16 %v43_v37, %v42_v36  ;;  %v26_v40 = vld [vmem:[%s389_s1 + $0x60] sm:$0xff]  ;;  %v27_v41 = vld [vmem:[%s389_s1 + $0x68] sm:$0xff]  ;;  %v44_v42 = vld [vmem:[%s389_s1 + $0xf0] sm:$0xff]  ;;  %p252_p2 = pnand %p250_p1, %p247_p0 }
   0xf   :  { %v45_v43 = vld [vmem:[%s389_s1 + $0xf8] sm:$0xff]  ;;  %v233_v44 = vpack.c.bf16 %v27_v41, %v26_v40  ;;  %v28_v46 = vld [vmem:[%s389_s1 + $0x70] sm:$0xff]  ;;  %v12_v49 = vld [vmem:[%s388_s0] sm:$0xff]  ;;  %vm135_vm0 = vcmp.eq.s32.totalorder %v117_v51, %v119_v52  ;;  %vm120_vm1 = vcmp.lt.s32.totalorder %v119_v52, 8 }
  0x10   :  { %v235_v45 = vpack.c.bf16 %v45_v43, %v44_v42  ;;  %v29_v47 = vld [vmem:[%s389_s1 + $0x78] sm:$0xff] }
  0x11   :  { %222 = vmatpush3.bf16.msra.mxu0 %v221_v26  ;;  %v237_v48 = vpack.c.bf16 %v29_v47, %v28_v46 }
  0x12   :  { %224 = vmatprep.subr.bf16.mxu0 %v223_v27 }
  0x15   :  { %226 = vmatpush3.bf16.msra.mxu0 %v225_v32 }
  0x16   :  { %228 = vmatprep.subr.bf16.mxu0 %v227_v33 }
  0x19   :  { %230 = vmatpush3.bf16.msra.mxu0 %v229_v38 }
  0x1a   :  { %232 = vmatprep.subr.bf16.mxu0 %v231_v39 }
  0x1d   :  { %234 = vmatpush3.bf16.msra.mxu0 %v233_v44 }
  0x1e   :  { %236 = vmatprep.subr.bf16.mxu0 %v235_v45 }
  0x21   :  { %238 = vmatpush3.bf16.msra.mxu0 %v237_v48 }
  0x24   :  { %111 = vmatmul.mubr.f32.vlgmr.msra.gmra.mrb[0].mxu0 %v12_v49 }
  0xf7   :  { %v204_v53 = vpop.f32.mrb[0].mxu0 }
  0xf8   :  { %v205_v54 = vpop.f32.mrb[1].mxu0 }
  0xf9   :  { %v206_v55 = vadd.f32 %v205_v54, %v204_v53 }
  0xfb   :  { %v136_v56 = vsel %vm135_vm0, %v206_v55, 0.0  ;;  %v121_v57 = vsel %vm120_vm1, %v206_v55, -1e+30 }
  0xfc   :  { %v137_v58 = vsel %vm122_vm2, %v136_v56, 0.0  ;;  %v123_v59 = vsel %vm122_vm2, %v121_v57, -inf }
  0xfd   :  { %138 = vadd.xlane.f32.xlu1 %v137_v58  ;;  %124 = vmax.xlane.f32.xlu0 %v123_v59 }
 0x18a   :  { %v125_v60 = vpop.xlane.xlu0 %124  ;;  %v139_v5 = vpop.xlane.xlu1 %138 }
 0x18b   :  { %v126_v61 = vsub.f32 %v121_v57, %v125_v60 }
 0x18d   :  { %v127_v62 = vmul.f32 1.442695, %v126_v61 }
 0x18f   :  { %242 = vpow2.f32 %v127_v62 }
 0x199   :  { %v243_v63 = vpop.eup %242 }
 0x19a   :  { %v129_v0 = vsel %vm122_vm2, %v243_v63, 0.0 }
 0x19b   :  { %130 = vadd.xlane.f32.xlu0 %v129_v0 }
 0x228   :  { %v131_v1 = vpop.xlane.xlu0 %130 }
 0x229   :  { %244 = vlog2.f32 %v131_v1 }
 0x233   :  { %v245_v2 = vpop.eup %244 }
 0x234   :  { %v133_v3 = vmul.f32 0.6931472, %v245_v2 }
 0x236   :  { %v134_v4 = vadd.f32 %v133_v3, %v125_v60 }
 0x238   :  { %v140_v6 = vsub.f32 %v134_v4, %v139_v5 }
 0x23a   :  { %v144_v7 = vsel %vm143_vm3, %v140_v6, 0.0 }
 0x23b   :  { %145 = vadd.xlane.f32.xlu1 %v144_v7 }
 0x2c8   :  { %v146_v8 = vpop.xlane.xlu1 %145 }
 0x2c9   :  { %v147_v9 = vrot.slane %v146_v8, 4 }
 0x2cb   :  { %v148_v10 = vadd.f32 %v147_v9, %v146_v8 }
 0x2cd   :  { %v149_v11 = vrot.slane %v148_v10, 2 }
 0x2cf   :  { %v150_v12 = vadd.f32 %v149_v11, %v148_v10 }
 0x2d1   :  { %v151_v13 = vrot.slane %v150_v12, 1 }
 0x2d3   :  { %v152_v14 = vadd.f32 %v151_v13, %v150_v12 }
 0x2d5   :  { %239 = vpush %v152_v14 }
 0x306   :  { %s240_s0 = spop %239 }
 0x307   :  { %s156_s1 = smul.f32 0.125, %s240_s0 }
 0x309   :  { %158 = sst [smem:[#allocation2]] %s156_s1 }
 0x30a   :  { %255 = shalt.err (!%p252_p2)
}
 0x30b   :  { %s258_s28 = smov [#allocation2]  }
 0x30c   :  { %166 = dma.smem_to_hbm %s258_s28, 16, %s390_s2, [#allocation3]  }
 0x30d   :  { %256 = dma.done.wait [#allocation3], 16  }
 0x30e   :  { %257 = vsyncadd [#allocation3], 4294967280 }
 0x30f   :  { %170 = sfence }
 0x310   :  { %171 = vsyncpa [#allocation3], 1 }

</bundles_post_ra>
